<compile_context>
chip_gen: v7x
topology: tpu7x:2x2x1
jax: 0.10.0
libtpu: 0.0.40
codegen_flags: <defaults>
</compile_context>

<pallas_src>
import jax
import jax.numpy as jnp
from jax import lax
from jax.experimental import pallas as pl
from jax.experimental.pallas import tpu as pltpu

_LANE = 128
_BN_EPS = 1e-5


def _round_up(n, m):
    return (n + m - 1) // m * m


def _bert_cls_kernel(x_ref, w1_ref, b1_ref, gamma_ref, beta_ref,
                     w2_ref, b2_ref, o_ref):
    # ---- Linear 1 (MXU, bf16 inputs, f32 accumulation) + bias + ReLU ----
    x = x_ref[...].astype(jnp.bfloat16)                       # (B, in_dim)
    h = jnp.dot(x, w1_ref[...], preferred_element_type=jnp.float32)
    h = jnp.maximum(h + b1_ref[...], 0.0)                     # (B, inter_p) f32

    # ---- BatchNorm1d, training-mode forward (batch stats, biased variance).
    # Statistics are over the FULL batch: batch dim is un-tiled on purpose.
    mean = jnp.mean(h, axis=0, keepdims=True)                 # (1, inter_p)
    centered = h - mean
    var = jnp.mean(centered * centered, axis=0, keepdims=True)
    h_hat = centered * lax.rsqrt(var + _BN_EPS)               # rsqrt -> EUP
    h_bn = h_hat * gamma_ref[...] + beta_ref[...]             # (B, inter_p)

    # ---- All event heads in one matmul -> lane-dense (B, heads_p) store ----
    out = jnp.dot(h_bn.astype(jnp.bfloat16), w2_ref[...],
                  preferred_element_type=jnp.float32)
    o_ref[...] = (out + b2_ref[...]).astype(o_ref.dtype)


def pack_params(params):
    """One-time host-side packing: pad intermediate + head dims to 128 lanes,
    fold all event heads into a single output matrix, pre-cast MXU weights to
    bf16.  Padding is all zeros -> numerically identical to the unpadded model.
    """
    w1 = params["w1"]                       # (in_dim, inter)
    b1 = params["b1"]                       # (1, inter)
    gamma, beta = params["gamma"], params["beta"]
    w2_all = params["w2_all"]               # (n_events, inter, n_out)
    b2_all = params["b2_all"]               # (n_events, 1, n_out)

    in_dim, inter = w1.shape
    n_events, _, n_out = w2_all.shape
    inter_p = _round_up(inter, _LANE)
    heads = n_events * n_out
    heads_p = _round_up(heads, _LANE)
    pad_i = inter_p - inter
    pad_h = heads_p - heads

    w1_p = jnp.pad(w1, ((0, 0), (0, pad_i))).astype(jnp.bfloat16)
    b1_p = jnp.pad(b1, ((0, 0), (0, pad_i))).astype(jnp.float32)
    gamma_p = jnp.pad(gamma, ((0, 0), (0, pad_i))).astype(jnp.float32)
    beta_p = jnp.pad(beta, ((0, 0), (0, pad_i))).astype(jnp.float32)

    # (n_events, inter, n_out) -> (inter, n_events * n_out), heads contiguous.
    w2 = jnp.transpose(w2_all, (1, 0, 2)).reshape(inter, heads)
    w2_p = jnp.pad(w2, ((0, pad_i), (0, pad_h))).astype(jnp.bfloat16)
    b2 = b2_all.reshape(1, heads)
    b2_p = jnp.pad(b2, ((0, 0), (0, pad_h))).astype(jnp.float32)

    return {
        "w1": w1_p, "b1": b1_p, "gamma": gamma_p, "beta": beta_p,
        "w2": w2_p, "b2": b2_p,
        "in_dim": in_dim, "inter_p": inter_p, "heads_p": heads_p,
        "n_events": n_events, "n_features_out": n_out,
    }


def bert_cls_multi_forward(hidden_states, packed, event_of_interest=1):
    """Forward pass of BertCLSMulti using packed (padded, bf16) parameters.

    hidden_states: (B, n_features_in, hidden_size) float32
    Returns (B, n_features_out) for the selected event head.
    """
    B = hidden_states.shape[0]
    x = hidden_states.reshape(B, -1)                 # flatten(start_dim=1)

    in_dim = packed["in_dim"]
    inter_p = packed["inter_p"]
    heads_p = packed["heads_p"]
    n_out = packed["n_features_out"]

    full = lambda shape: pl.BlockSpec(shape, lambda: (0,) * len(shape))

    out_all = pl.pallas_call(
        _bert_cls_kernel,
        out_shape=jax.ShapeDtypeStruct((B, heads_p), jnp.float32),
        in_specs=[
            full((B, in_dim)),
            full((in_dim, inter_p)),
            full((1, inter_p)),
            full((1, inter_p)),
            full((1, inter_p)),
            full((inter_p, heads_p)),
            full((1, heads_p)),
        ],
        out_specs=full((B, heads_p)),
        compiler_params=pltpu.CompilerParams(dimension_semantics=()),
    )(x, packed["w1"], packed["b1"], packed["gamma"], packed["beta"],
      packed["w2"], packed["b2"])

    # Head selection: a lane slice of the all-heads output.  The kernel/compile
    # is identical for every event_of_interest.
    start = (event_of_interest - 1) * n_out
    return out_all[:, start:start + n_out]


def _reference_forward(hidden_states, params, event_of_interest=1):
    """Pure-JAX f32 reference matching the PyTorch module (train-mode BN)."""
    B = hidden_states.shape[0]
    x = hidden_states.reshape(B, -1)
    h = jnp.maximum(x @ params["w1"] + params["b1"], 0.0)
    mean = jnp.mean(h, axis=0, keepdims=True)
    var = jnp.mean((h - mean) ** 2, axis=0, keepdims=True)
    h_bn = (h - mean) / jnp.sqrt(var + _BN_EPS) * params["gamma"] + params["beta"]
    w2 = params["w2_all"][event_of_interest - 1]
    b2 = params["b2_all"][event_of_interest - 1]
    return h_bn @ w2 + b2


def init_params(key, n_features_in, n_events, n_features_out,
                hidden_size=16, intermediate_size=64):
    """Deterministic synthetic init mirroring the PyTorch __init__ shapes."""
    in_dim = hidden_size * n_features_in
    k1, k2, k3, k4 = jax.random.split(key, 4)

    # DenseVanillaBlock linear: kaiming_normal_(relu) -> std = sqrt(2/fan_in)
    w1 = jax.random.normal(k1, (in_dim, intermediate_size), jnp.float32) * jnp.sqrt(
        2.0 / in_dim)
    bound1 = 1.0 / jnp.sqrt(float(in_dim))
    b1 = jax.random.uniform(k2, (1, intermediate_size), jnp.float32,
                            -bound1, bound1)

    # BatchNorm1d default affine init: gamma=1, beta=0
    gamma = jnp.ones((1, intermediate_size), jnp.float32)
    beta = jnp.zeros((1, intermediate_size), jnp.float32)

    # Output heads: nn.Linear default init scale
    bound2 = 1.0 / jnp.sqrt(float(intermediate_size))
    w2_all = jax.random.uniform(
        k3, (n_events, intermediate_size, n_features_out), jnp.float32,
        -bound2, bound2)
    b2_all = jax.random.uniform(
        k4, (n_events, 1, n_features_out), jnp.float32, -bound2, bound2)

    return {"w1": w1, "b1": b1, "gamma": gamma, "beta": beta,
            "w2_all": w2_all, "b2_all": b2_all}


if __name__ == "__main__":
    B = 8
    n_features_in = 4
    hidden_size = 16
    intermediate_size = 64
    n_events = 2
    n_features_out = 8

    key = jax.random.PRNGKey(0)
    kx, kp = jax.random.split(key)

    hidden_states = jax.random.normal(
        kx, (B, n_features_in, hidden_size), jnp.float32)
    params = init_params(kp, n_features_in, n_events, n_features_out,
                         hidden_size=hidden_size,
                         intermediate_size=intermediate_size)
    packed = pack_params(params)

    ok = True
    for event in (1, 2):   # both heads come from the same compiled kernel
        out = bert_cls_multi_forward(hidden_states, packed,
                                     event_of_interest=event)
        jax.block_until_ready(out)
        assert out.shape == (B, n_features_out)
        ref = _reference_forward(hidden_states, params,
                                 event_of_interest=event)
        max_err = float(jnp.max(jnp.abs(out - ref)))
        # bf16 MXU inputs with f32 accumulation -> small rounding vs f32 ref.
        ok = ok and (max_err < 5e-2)

    assert ok, "kernel output diverged from f32 reference"
    print("KERNEL_OK")
</pallas_src>

<mosaic_0001>
module attributes {stable_mosaic.version = 11 : i64} {
  func.func @_bert_cls_kernel(%arg0: memref<8x64xf32, #tpu.memory_space<vmem>>, %arg1: memref<64x128xbf16, #tpu.memory_space<vmem>>, %arg2: memref<1x128xf32, #tpu.memory_space<vmem>>, %arg3: memref<1x128xf32, #tpu.memory_space<vmem>>, %arg4: memref<1x128xf32, #tpu.memory_space<vmem>>, %arg5: memref<128x128xbf16, #tpu.memory_space<vmem>>, %arg6: memref<1x128xf32, #tpu.memory_space<vmem>>, %arg7: memref<8x128xf32, #tpu.memory_space<vmem>>) attributes {dimension_semantics = [], scalar_prefetch = 0 : i64, scratch_operands = 0 : i64, tpu.core_type = #tpu.core_type<tc>} {
    %c0 = arith.constant 0 : index
    %c0_0 = arith.constant 0 : index
    %0 = vector.load %arg0[%c0, %c0_0] : memref<8x64xf32, #tpu.memory_space<vmem>>, vector<8x64xf32>
    %1 = arith.truncf %0 : vector<8x64xf32> to vector<8x64xbf16>
    %c0_1 = arith.constant 0 : index
    %c0_2 = arith.constant 0 : index
    %2 = vector.load %arg1[%c0_1, %c0_2] : memref<64x128xbf16, #tpu.memory_space<vmem>>, vector<64x128xbf16>
    %cst = arith.constant dense<0.000000e+00> : vector<8x128xf32>
    %3 = tpu.matmul %1, %2, %cst {dimension_numbers = #tpu.dot_dimension_numbers<[1], [0], [0], [1], [0, 0, 1, 1], [], []>} : vector<8x64xbf16>, vector<64x128xbf16>, vector<8x128xf32> -> vector<8x128xf32>
    %c0_3 = arith.constant 0 : index
    %c0_4 = arith.constant 0 : index
    %4 = vector.load %arg2[%c0_3, %c0_4] : memref<1x128xf32, #tpu.memory_space<vmem>>, vector<1x128xf32>
    %5 = vector.broadcast %4 : vector<1x128xf32> to vector<8x128xf32>
    %6 = arith.addf %3, %5 : vector<8x128xf32>
    %cst_5 = arith.constant 0.000000e+00 : f32
    %7 = vector.broadcast %cst_5 : f32 to vector<8x128xf32>
    %8 = arith.maximumf %6, %7 : vector<8x128xf32>
    %cst_6 = arith.constant dense<0.000000e+00> : vector<128xf32>
    %9 = vector.multi_reduction <add>, %8, %cst_6 [0] : vector<8x128xf32> to vector<128xf32>
    %10 = vector.shape_cast %9 : vector<128xf32> to vector<1x128xf32>
    %cst_7 = arith.constant 8.000000e+00 : f32
    %11 = vector.broadcast %cst_7 : f32 to vector<1x128xf32>
    %12 = arith.divf %10, %11 : vector<1x128xf32>
    %13 = vector.broadcast %12 : vector<1x128xf32> to vector<8x128xf32>
    %14 = arith.subf %8, %13 : vector<8x128xf32>
    %15 = arith.mulf %14, %14 : vector<8x128xf32>
    %cst_8 = arith.constant dense<0.000000e+00> : vector<128xf32>
    %16 = vector.multi_reduction <add>, %15, %cst_8 [0] : vector<8x128xf32> to vector<128xf32>
    %17 = vector.shape_cast %16 : vector<128xf32> to vector<1x128xf32>
    %cst_9 = arith.constant 8.000000e+00 : f32
    %18 = vector.broadcast %cst_9 : f32 to vector<1x128xf32>
    %19 = arith.divf %17, %18 : vector<1x128xf32>
    %cst_10 = arith.constant 9.99999974E-6 : f32
    %20 = vector.broadcast %cst_10 : f32 to vector<1x128xf32>
    %21 = arith.addf %19, %20 : vector<1x128xf32>
    %22 = math.rsqrt %21 : vector<1x128xf32>
    %23 = vector.broadcast %22 : vector<1x128xf32> to vector<8x128xf32>
    %24 = arith.mulf %14, %23 : vector<8x128xf32>
    %c0_11 = arith.constant 0 : index
    %c0_12 = arith.constant 0 : index
    %25 = vector.load %arg3[%c0_11, %c0_12] : memref<1x128xf32, #tpu.memory_space<vmem>>, vector<1x128xf32>
    %26 = vector.broadcast %25 : vector<1x128xf32> to vector<8x128xf32>
    %27 = arith.mulf %24, %26 : vector<8x128xf32>
    %c0_13 = arith.constant 0 : index
    %c0_14 = arith.constant 0 : index
    %28 = vector.load %arg4[%c0_13, %c0_14] : memref<1x128xf32, #tpu.memory_space<vmem>>, vector<1x128xf32>
    %29 = vector.broadcast %28 : vector<1x128xf32> to vector<8x128xf32>
    %30 = arith.addf %27, %29 : vector<8x128xf32>
    %31 = arith.truncf %30 : vector<8x128xf32> to vector<8x128xbf16>
    %c0_15 = arith.constant 0 : index
    %c0_16 = arith.constant 0 : index
    %32 = vector.load %arg5[%c0_15, %c0_16] : memref<128x128xbf16, #tpu.memory_space<vmem>>, vector<128x128xbf16>
    %cst_17 = arith.constant dense<0.000000e+00> : vector<8x128xf32>
    %33 = tpu.matmul %31, %32, %cst_17 {dimension_numbers = #tpu.dot_dimension_numbers<[1], [0], [0], [1], [0, 0, 1, 1], [], []>} : vector<8x128xbf16>, vector<128x128xbf16>, vector<8x128xf32> -> vector<8x128xf32>
    %c0_18 = arith.constant 0 : index
    %c0_19 = arith.constant 0 : index
    %34 = vector.load %arg6[%c0_18, %c0_19] : memref<1x128xf32, #tpu.memory_space<vmem>>, vector<1x128xf32>
    %35 = vector.broadcast %34 : vector<1x128xf32> to vector<8x128xf32>
    %36 = arith.addf %33, %35 : vector<8x128xf32>
    %c0_20 = arith.constant 0 : index
    %c0_21 = arith.constant 0 : index
    %37 = vector.load %arg7[%c0_20, %c0_21] : memref<8x128xf32, #tpu.memory_space<vmem>>, vector<8x128xf32>
    tpu.vector_store %arg7[%c0_20, %c0_21], %36 {strides = array<i32>} : memref<8x128xf32, #tpu.memory_space<vmem>>, vector<8x128xf32>,
    return
  }
}

</mosaic_0001>

<bundles_post_ra>
// kernel: tpu_custom_call.1
= control target key start
LH: loop header
LB: loop body
LE: loop exit
PB: predicated region body
PF: predicated region fallthrough
CT: control target
= control target key end

     0   :  { %12 = vsyncpa [#allocation3], 0  ;;  %s611_s0 = inlined_call_operand.hbm [shape: f32[8,64], index: 0, kind: input, shape index: {}]   ;;  %s612_s1 = inlined_call_operand.hbm [shape: bf16[64,128], index: 1, kind: input, shape index: {}]   ;;  %s613_s2 = inlined_call_operand.vmem [shape: f32[1,128], index: 2, kind: input, shape index: {}]   ;;  %s614_s3 = inlined_call_operand.vmem [shape: f32[1,128], index: 3, kind: input, shape index: {}]   ;;  %s615_s4 = inlined_call_operand.vmem [shape: f32[1,128], index: 4, kind: input, shape index: {}]   ;;  %s616_s5 = inlined_call_operand.hbm [shape: bf16[128,128], index: 5, kind: input, shape index: {}]   ;;  %s617_s6 = inlined_call_operand.vmem [shape: f32[1,128], index: 6, kind: input, shape index: {}]   ;;  %s618_s7 = inlined_call_operand.hbm [shape: f32[8,128], index: 7, kind: output, shape index: {}]  }
   0x1   :  { %13 = vsyncpa [#allocation6], 0 }
   0x2   :  { %14 = vsyncpa [#allocation4], 0  ;;  %s497_s24 = smov [#allocation5]   ;;  %s403_s28 = scalar_lea.hbm %s612_s1, 512 }
   0x3   :  { %s30_s25 = sshll.u32 %s497_s24, 4  ;;  %p404_p0 = scmp.ne.s32.totalorder %s612_s1, %s403_s28  ;;  %s31_s25 = int_to_ptr.vmem [resolvable:$true] %s30_s25 }
   0x4   :  { %p407_p1 = scmp.lt.u32.totalorder %s403_s28, %s612_s1 }
   0x6   :  { %p409_p2 = pnand %p407_p1, %p404_p0 }
   0x8   :  { %412 = shalt.err (!%p409_p2)
}
   0x9   :  { %s413_s10 = scalar_lea.vmem %s31_s25, 512  ;;  %p418_p4 = scmp.lt.s32.totalorder %s31_s25, %s31_s25 }
   0xa   :  { %p414_p3 = scmp.ne.s32.totalorder %s31_s25, %s413_s10  ;;  %p419_p5 = scmp.lt.s32.totalorder %s413_s10, %s413_s10 }
   0xc   :  { %p420_p6 = por %p419_p5, %p418_p4 }
   0xe   :  { %p421_p7 = pnand %p420_p6, %p414_p3 }
  0x10   :  { %424 = shalt.err (!%p421_p7)
}
  0x11   :  { %s498_s11 = smov 64   ;;  %s499_s12 = smov 4  }
  0x12   :  { %36 = dma.hbm_to_vmem [thread:$0]  %s612_s1, 512, %s31_s25, [#allocation6], %s498_s11, %s498_s11, %s499_s12  }
  0x13   :  { %s500_s15 = smov [#allocation2]   ;;  %s501_s17 = smov [#allocation7]  }
  0x14   :  { %s21_s16 = sshll.u32 %s500_s15, 4  ;;  %s48_s18 = sshll.u32 %s501_s17, 4  ;;  %s22_s16 = int_to_ptr.vmem [resolvable:$true] %s21_s16  ;;  %s49_s18 = int_to_ptr.vmem [resolvable:$true] %s48_s18 }
  0x15   :  { %s425_s21 = scalar_lea.hbm %s611_s0, 128 }
  0x16   :  { %p426_p8 = scmp.ne.s32.totalorder %s611_s0, %s425_s21  ;;  %p429_p9 = scmp.lt.u32.totalorder %s425_s21, %s611_s0 }
  0x18   :  { %p431_p10 = pnand %p429_p9, %p426_p8 }
  0x1a   :  { %434 = shalt.err (!%p431_p10)
}
  0x1b   :  { %s435_s1 = scalar_lea.vmem %s22_s16, 128  ;;  %p440_p12 = scmp.lt.s32.totalorder %s22_s16, %s22_s16 }
  0x1c   :  { %p436_p11 = scmp.ne.s32.totalorder %s22_s16, %s435_s1  ;;  %p441_p13 = scmp.lt.s32.totalorder %s435_s1, %s435_s1 }
  0x1e   :  { %p442_p0 = por %p441_p13, %p440_p12 }
  0x20   :  { %p443_p1 = pnand %p442_p0, %p436_p11 }
  0x22   :  { %446 = shalt.err (!%p443_p1)
}
  0x23   :  { %24 = dma.hbm_to_vmem [thread:$0]  %s611_s0, 128, %s22_s16, [#allocation3]  }
  0x24   :  { %s447_s30 = scalar_lea.hbm %s616_s5, 1024 }
  0x25   :  { %p448_p2 = scmp.ne.s32.totalorder %s616_s5, %s447_s30  ;;  %p451_p3 = scmp.lt.u32.totalorder %s447_s30, %s616_s5 }
  0x27   :  { %p453_p4 = pnand %p451_p3, %p448_p2 }
  0x29   :  { %456 = shalt.err (!%p453_p4)
}
  0x2a   :  { %s457_s14 = scalar_lea.vmem %s49_s18, 1024  ;;  %p462_p6 = scmp.lt.s32.totalorder %s49_s18, %s49_s18 }
  0x2b   :  { %p458_p5 = scmp.ne.s32.totalorder %s49_s18, %s457_s14  ;;  %p463_p7 = scmp.lt.s32.totalorder %s457_s14, %s457_s14 }
  0x2d   :  { %p464_p8 = por %p463_p7, %p462_p6 }
  0x2f   :  { %p465_p9 = pnand %p464_p8, %p458_p5 }
  0x31   :  { %468 = shalt.err (!%p465_p9)
}
  0x32   :  { %54 = dma.hbm_to_vmem [thread:$0]  %s616_s5, 1024, %s49_s18, [#allocation6], %s498_s11, %s498_s11, %s499_s12  }
  0x33   :  { %491 = dma.done.wait [#allocation3], 128  }
  0x34   :  { %492 = vsyncadd [#allocation3], 4294967168 }
  0x35   :  { %493 = dma.done.wait [#allocation6], 1536  }
  0x36   :  { %494 = vsyncadd [#allocation6], 4294965760  ;;  %v502_v0 = vmov 0.0   ;;  %vm503_vm0 = vmmov 0   ;;  %v389_v1 = vld [vmem:[#allocation5] sm:$0xff]   ;;  %v390_v2 = vld [vmem:[#allocation5 + $0x8] sm:$0xff]  }
  0x37   :  { %349 = vmatprep.subr.bf16.mxu0 %v502_v0  ;;  %357 = vmatprep.mubr.msk.bf16.mxu0 %vm503_vm0, %v502_v0  ;;  %v391_v3 = vld [vmem:[#allocation5 + $0x10] sm:$0xff]   ;;  %v392_v4 = vld [vmem:[#allocation5 + $0x18] sm:$0xff]   ;;  %vm108_vm1 = vcmask 523264   ;;  %v393_v7 = vld [vmem:[#allocation7] sm:$0xff]   ;;  %s504_s20 = smov [#allocation8]  }
  0x38   :  { %361 = vmatprep.subr.bf16.mxu1 %v502_v0  ;;  %377 = vmatprep.mubr.msk.bf16.mxu1 %vm503_vm0, %v502_v0  ;;  %v67_v5 = vld [vmem:[#allocation2] sm:$0xff]  ;;  %v394_v8 = vld [vmem:[#allocation7 + $0x8] sm:$0xff]   ;;  %v395_v9 = vld [vmem:[#allocation7 + $0x10] sm:$0xff]   ;;  %s308_s21 = sshll.u32 %s504_s20, 4  ;;  %s309_s21 = int_to_ptr.vmem [resolvable:$true] %s308_s21 }
  0x39   :  { %350 = vmatpush3.bf16.msra.mxu0 %v389_v1  ;;  %v68_v6 = vpack.c.bf16 %v67_v5, %v67_v5  ;;  %362 = vmatpush3.bf16.msra.mxu1 %v393_v7  ;;  %v396_v10 = vld [vmem:[#allocation7 + $0x18] sm:$0xff]   ;;  %v397_v11 = vld [vmem:[#allocation7 + $0x20] sm:$0xff]   ;;  %v398_v12 = vld [vmem:[#allocation7 + $0x28] sm:$0xff]   ;;  %p474_p11 = scmp.lt.s32.totalorder %s309_s21, %s309_s21 }
  0x3a   :  { %351 = vmatprep.subr.bf16.mxu0 %v502_v0  ;;  %363 = vmatprep.subr.bf16.mxu1 %v502_v0  ;;  %v399_v13 = vld [vmem:[#allocation7 + $0x30] sm:$0xff]   ;;  %v400_v14 = vld [vmem:[#allocation7 + $0x38] sm:$0xff]  }
  0x3b   :  { %v318_v15 = vld [vmem:[%s613_s2] ss:$0 sm:$0xff] }
  0x3c   :  { %v324_v40 = vld [vmem:[%s614_s3] ss:$0 sm:$0xff]  ;;  %s469_s3 = scalar_lea.vmem %s309_s21, 128 }
  0x3d   :  { %352 = vmatpush3.bf16.msra.mxu0 %v390_v2  ;;  %364 = vmatpush3.bf16.msra.mxu1 %v394_v8  ;;  %v325_v42 = vld [vmem:[%s615_s4] ss:$0 sm:$0xff]  ;;  %p470_p10 = scmp.ne.s32.totalorder %s309_s21, %s469_s3  ;;  %p475_p12 = scmp.lt.s32.totalorder %s469_s3, %s469_s3 }
  0x3e   :  { %353 = vmatprep.subr.bf16.mxu0 %v502_v0  ;;  %365 = vmatprep.subr.bf16.mxu1 %v502_v0  ;;  %v326_v46 = vld [vmem:[%s617_s6] ss:$0 sm:$0xff] }
  0x3f   :  { %p476_p13 = por %p475_p12, %p474_p11 }
  0x41   :  { %354 = vmatpush3.bf16.msra.mxu0 %v391_v3  ;;  %366 = vmatpush3.bf16.msra.mxu1 %v395_v9  ;;  %p477_p0 = pnand %p476_p13, %p470_p10 }
  0x42   :  { %355 = vmatprep.subr.bf16.mxu0 %v502_v0  ;;  %367 = vmatprep.subr.bf16.mxu1 %v502_v0 }
  0x45   :  { %356 = vmatpush3.bf16.msra.mxu0 %v392_v4  ;;  %368 = vmatpush3.bf16.msra.mxu1 %v396_v10 }
  0x46   :  { %369 = vmatprep.subr.bf16.mxu1 %v502_v0 }
  0x48   :  { %358 = vmatmul.mubr.msk.bf16.vlgmr.msra.gmra.mrb[0].mxu0 %vm108_vm1, %v68_v6 }
  0x49   :  { %370 = vmatpush3.bf16.msra.mxu1 %v397_v11 }
  0x4a   :  { %371 = vmatprep.subr.bf16.mxu1 %v502_v0 }
  0x4d   :  { %372 = vmatpush3.bf16.msra.mxu1 %v398_v12 }
  0x4e   :  { %373 = vmatprep.subr.bf16.mxu1 %v502_v0 }
  0x51   :  { %374 = vmatpush3.bf16.msra.mxu1 %v399_v13 }
  0x52   :  { %375 = vmatprep.subr.bf16.mxu1 %v502_v0 }
  0x55   :  { %376 = vmatpush3.bf16.msra.mxu1 %v400_v14 }
 0x11b   :  { %v146_v16 = vpop.f32.mrb[0].mxu0 }
 0x11c   :  { %v147_v17 = vadd.f32 %v318_v15, %v146_v16  ;;  %v359_v18 = vpop.f32.mrb[1].mxu0 }
 0x11d   :  { %v149_v19 = vpop.f32.mrb[2].mxu0 }
 0x11e   :  { %v152_v20 = vmax.f32 %v147_v17, 0.0  ;;  %v360_v21 = vpop.f32.mrb[3].mxu0 }
 0x120   :  { %v153_v22 = vrot.slane %v152_v20, 4 }
 0x122   :  { %v154_v23 = vadd.f32 %v153_v22, %v152_v20 }
 0x124   :  { %v155_v24 = vrot.slane %v154_v23, 2 }
 0x126   :  { %v156_v25 = vadd.f32 %v155_v24, %v154_v23 }
 0x128   :  { %v157_v26 = vrot.slane %v156_v25, 1 }
 0x12a   :  { %v158_v27 = vadd.f32 %v157_v26, %v156_v25 }
 0x12c   :  { %v160_v28 = vmul.f32 0.125, %v158_v27 }
 0x12e   :  { %v161_v29 = vsub.f32 %v152_v20, %v160_v28 }
 0x130   :  { %v162_v30 = vmul.f32 %v161_v29, %v161_v29 }
 0x132   :  { %v163_v31 = vrot.slane %v162_v30, 4 }
 0x134   :  { %v164_v32 = vadd.f32 %v163_v31, %v162_v30 }
 0x136   :  { %v165_v33 = vrot.slane %v164_v32, 2 }
 0x138   :  { %v166_v34 = vadd.f32 %v165_v33, %v164_v32 }
 0x13a   :  { %v167_v35 = vrot.slane %v166_v34, 1 }
 0x13c   :  { %v168_v36 = vadd.f32 %v167_v35, %v166_v34 }
 0x13e   :  { %v169_v37 = vmul.f32 0.125, %v168_v36 }
 0x140   :  { %v170_v38 = vadd.f32 1e-05, %v169_v37 }
 0x142   :  { %401 = vrsqrt.f32 %v170_v38 }
 0x14c   :  { %v402_v39 = vpop.eup %401 }
 0x14d   :  { %v172_v41 = vmul.f32 %v402_v39, %v161_v29 }
 0x14f   :  { %v180_v43 = vmul.f32 %v324_v40, %v172_v41 }
 0x151   :  { %v188_v44 = vadd.f32 %v325_v42, %v180_v43 }
 0x153   :  { %v189_v45 = vpack.c.bf16 %v188_v44, %v188_v44 }
 0x155   :  { %378 = vmatmul.mubr.bf16.vlgmr.msra.gmra.mrb[0].mxu1 %v189_v45 }
 0x228   :  { %v295_v47 = vpop.f32.mrb[0].mxu1 }
 0x229   :  { %v296_v48 = vadd.f32 %v326_v46, %v295_v47  ;;  %v379_v49 = vpop.f32.mrb[1].mxu1 }
 0x22a   :  { %v298_v50 = vpop.f32.mrb[2].mxu1 }
 0x22b   :  { %301 = vst [vmem:[#allocation8] sm:$0xff] %v296_v48  ;;  %v380_v51 = vpop.f32.mrb[3].mxu1 }
 0x22c   :  { %480 = shalt.err (!%p477_p0)
}
 0x22d   :  { %s481_s6 = scalar_lea.hbm %s618_s7, 128 }
 0x22e   :  { %p482_p1 = scmp.ne.s32.totalorder %s618_s7, %s481_s6  ;;  %p485_p2 = scmp.lt.u32.totalorder %s481_s6, %s618_s7 }
 0x230   :  { %p487_p3 = pnand %p485_p2, %p482_p1 }
 0x232   :  { %490 = shalt.err (!%p487_p3)
}
 0x233   :  { %311 = dma.vmem_to_hbm [thread:$0]  %s309_s21, 128, %s618_s7, [#allocation4]  }
 0x234   :  { %495 = dma.done.wait [#allocation4], 128  }
 0x235   :  { %496 = vsyncadd [#allocation4], 4294967168 }
 0x236   :  { %315 = vsyncpa [#allocation3], 1 }
 0x237   :  { %316 = vsyncpa [#allocation6], 1 }
 0x238   :  { %317 = vsyncpa [#allocation4], 1 }

</bundles_post_ra>
